<compile_context>
chip_gen: v7x
topology: tpu7x:2x2x1
jax: 0.10.0
libtpu: 0.0.40
codegen_flags: <defaults>
</compile_context>

<pallas_src>
import jax
import jax.numpy as jnp
from jax.experimental import pallas as pl
from jax.experimental.pallas import tpu as pltpu


def _chomp_copy_kernel(x_ref, o_ref):
    # Pure bandwidth-bound tile copy.  The input block may carry a few extra
    # trailing columns (chomped tail / 128-lane alignment); the static slice
    # drops them.  In the tiled path input and output blocks are identical.
    o_ref[...] = x_ref[:, : o_ref.shape[-1]]


def _round_up(v: int, m: int) -> int:
    return ((v + m - 1) // m) * m


def chomp1d(x: jax.Array, chomp_size: int, *, row_tile: int = 512,
            len_tile: int = 4096) -> jax.Array:
    """x: (N, C, L) -> (N, C, L - chomp_size), dtype preserved."""
    assert chomp_size > 0, "chomp_size must be positive (matches x[:, :, :-c])"
    assert row_tile % 32 == 0, "row_tile must stay a multiple of 32 (sublane packing)"
    assert len_tile % 128 == 0, "len_tile must be a multiple of 128 (lane-dense)"
    n, c, l = x.shape
    out_len = l - chomp_size
    assert out_len > 0, "chomp_size must be smaller than the sequence length"

    # Tiny keep-length: <128-lane output tiles force masked vst.msk stores (the
    # single biggest measured Pallas penalty) for a tensor that is tiny anyway.
    # XLA's native slice copy is strictly better here.
    if out_len < 128:
        return x[:, :, :out_len]

    # Collapse (N, C) into one row axis: the slice only touches the last axis,
    # and both reshapes are free for the default contiguous layout.
    rows = n * c
    x2 = x.reshape(rows, l)

    # Row tile: multiple of 32 sublanes, or the full row extent when small
    # (full-dim blocks are always legal).
    tr = rows if rows <= row_tile else row_tile

    if out_len <= len_tile:
        # One full-extent length block: avoids a second, nearly-all-masked tile
        # and its grid-step overhead.
        tl_out = out_len
        # Input block 128-lane aligned (or full L if shorter): reads at most
        # 127 columns of the chomped tail, keeps loads unmasked.
        tl_in = min(l, _round_up(out_len, 128))
    else:
        # Tiled path: lane-dense 128-multiple tiles; only the final partial
        # tile has masked output stores / clamped input reads.
        tl_out = len_tile
        tl_in = len_tile

    grid_r = pl.cdiv(rows, tr)
    grid_l = pl.cdiv(out_len, tl_out)

    # Put the larger axis first so v7x's two TensorCores can always split the
    # leading parallel axis; harmless on single-TC v5e/v6e.
    if grid_r >= grid_l:
        grid = (grid_r, grid_l)
        idx = lambda i, j: (i, j)
    else:
        grid = (grid_l, grid_r)
        idx = lambda j, i: (i, j)

    # Read + write of the kept region only (zero FLOPs).
    nbytes = 2 * rows * out_len * x.dtype.itemsize

    out2 = pl.pallas_call(
        _chomp_copy_kernel,
        out_shape=jax.ShapeDtypeStruct((rows, out_len), x.dtype),
        grid_spec=pltpu.PrefetchScalarGridSpec(
            num_scalar_prefetch=0,
            grid=grid,
            in_specs=[pl.BlockSpec((tr, tl_in), idx)],
            out_specs=pl.BlockSpec((tr, tl_out), idx),
        ),
        compiler_params=pltpu.CompilerParams(
            # Every tile is independent -> both axes parallel (megacore on v7x).
            dimension_semantics=("parallel", "parallel"),
            # 2x double-buffered (in + out) 8 MiB f32 blocks = 32 MiB; 48 MiB
            # keeps headroom and still fits v7x's 64 MiB physical VMEM while
            # overriding v5e's 16 MiB default scoped limit.
            vmem_limit_bytes=48 * 1024 * 1024,
        ),
        # Zero FLOPs: let XLA schedule/overlap it as a pure-bandwidth op.
        cost_estimate=pl.CostEstimate(flops=0, transcendentals=0,
                                      bytes_accessed=nbytes),
    )(x2)
    return out2.reshape(n, c, out_len)


if __name__ == "__main__":
    key = jax.random.PRNGKey(0)
    k1, k2, k3 = jax.random.split(key, 3)

    # Primary example: Conv1d-style activation (batch, channels, seq_len) as
    # Chomp1d sees inside a TCN block.  out_len = 254 >= 128 -> Pallas path
    # with a single full-extent length block.
    batch, channels, seq_len, chomp_size = 2, 4, 256, 2
    x = jax.random.normal(k1, (batch, channels, seq_len), dtype=jnp.float32)
    out = jax.block_until_ready(chomp1d(x, chomp_size))
    assert out.shape == (batch, channels, seq_len - chomp_size), out.shape
    assert out.dtype == x.dtype
    assert jnp.array_equal(out, x[:, :, :-chomp_size]), "mismatch (single-block path)"

    # Tiled path: small len_tile to exercise multiple 128-multiple length tiles
    # plus a masked/clamped partial final tile.
    b2, c2, l2, ch2 = 2, 4, 1203, 3
    x2 = jax.random.normal(k2, (b2, c2, l2), dtype=jnp.float32)
    out2 = jax.block_until_ready(chomp1d(x2, ch2, len_tile=512))
    assert jnp.array_equal(out2, x2[:, :, :-ch2]), "mismatch (tiled path)"

    # Tiny sequence: out_len < 128 -> XLA slice fallback.
    b3, c3, l3, ch3 = 2, 4, 16, 2
    x3 = jax.random.normal(k3, (b3, c3, l3), dtype=jnp.float32)
    out3 = jax.block_until_ready(chomp1d(x3, ch3))
    assert jnp.array_equal(out3, x3[:, :, :-ch3]), "mismatch (small fallback path)"

    print("KERNEL_OK")
</pallas_src>

<mosaic_0001>
module attributes {stable_mosaic.version = 11 : i64} {
  func.func @_chomp_copy_kernel(%arg0: i32, %arg1: i32, %arg2: memref<8x256xf32, #tpu.memory_space<vmem>>, %arg3: memref<8x254xf32, #tpu.memory_space<vmem>>) attributes {dimension_semantics = [#tpu.dimension_semantics<parallel>, #tpu.dimension_semantics<parallel>], iteration_bounds = array<i64: 1, 1>, scalar_prefetch = 0 : i64, scratch_operands = 0 : i64, tpu.core_type = #tpu.core_type<tc>, window_params = [{transform_indices = @transform_0, window_bounds = array<i64: 8, 256>}, {transform_indices = @transform_1, window_bounds = array<i64: 8, 254>}]} {
    %c0 = arith.constant 0 : index
    %c0_0 = arith.constant 0 : index
    %0 = vector.load %arg2[%c0, %c0_0] : memref<8x256xf32, #tpu.memory_space<vmem>>, vector<8x254xf32>
    %c0_1 = arith.constant 0 : index
    %c0_2 = arith.constant 0 : index
    %1 = vector.load %arg3[%c0_1, %c0_2] : memref<8x254xf32, #tpu.memory_space<vmem>>, vector<8x254xf32>
    tpu.vector_store %arg3[%c0_1, %c0_2], %0 {strides = array<i32>} : memref<8x254xf32, #tpu.memory_space<vmem>>, vector<8x254xf32>,
    return
  }
  func.func @transform_0(%arg0: i32, %arg1: i32) -> (i32, i32) {
    %c0_i32 = arith.constant 0 : i32
    return %arg0, %arg1 : i32, i32
  }
  func.func @transform_1(%arg0: i32, %arg1: i32) -> (i32, i32) {
    %c0_i32 = arith.constant 0 : i32
    return %arg0, %arg1 : i32, i32
  }
}

</mosaic_0001>

<bundles_post_ra>
// kernel: tpu_custom_call.1
= control target key start
LH: loop header
LB: loop body
LE: loop exit
PB: predicated region body
PF: predicated region fallthrough
CT: control target
= control target key end

     0   :  { %6 = vsyncpa [#allocation3], 0  ;;  %s127_s0 = inlined_call_operand.hbm [shape: f32[8,256], index: 0, kind: input, shape index: {}]   ;;  %s128_s1 = inlined_call_operand.hbm [shape: f32[8,254], index: 1, kind: output, shape index: {}]  }
   0x1   :  { %7 = vsyncpa [#allocation4], 0  ;;  %s91_s6 = smov [#allocation2]   ;;  %s43_s10 = scalar_lea.hbm %s127_s0, 256 }
   0x2   :  { %s14_s7 = sshll.u32 %s91_s6, 4  ;;  %p44_p0 = scmp.ne.s32.totalorder %s127_s0, %s43_s10  ;;  %s15_s7 = int_to_ptr.vmem [resolvable:$true] %s14_s7 }
   0x3   :  { %p47_p1 = scmp.lt.u32.totalorder %s43_s10, %s127_s0 }
   0x5   :  { %p49_p2 = pnand %p47_p1, %p44_p0 }
   0x7   :  { %52 = shalt.err (!%p49_p2)
}
   0x8   :  { %s53_s15 = scalar_lea.vmem %s15_s7, 256  ;;  %p58_p4 = scmp.lt.s32.totalorder %s15_s7, %s15_s7 }
   0x9   :  { %p54_p3 = scmp.ne.s32.totalorder %s15_s7, %s53_s15  ;;  %p59_p5 = scmp.lt.s32.totalorder %s53_s15, %s53_s15 }
   0xb   :  { %p60_p6 = por %p59_p5, %p58_p4 }
   0xd   :  { %p61_p7 = pnand %p60_p6, %p54_p3 }
   0xf   :  { %64 = shalt.err (!%p61_p7)
}
  0x10   :  { %17 = dma.hbm_to_vmem [thread:$0]  %s127_s0, 256, %s15_s7, [#allocation3]  }
  0x11   :  { %87 = dma.done.wait [#allocation3], 256  }
  0x12   :  { %88 = vsyncadd [#allocation3], 4294967040  ;;  %s92_s18 = smov [#allocation5]   ;;  %vm24_vm0 = vcmask 1031168   ;;  %v21_v0 = vld [vmem:[#allocation2] sm:$0xff]  ;;  %v22_v1 = vld [vmem:[#allocation2 + $0x8] sm:$0xff] }
  0x13   :  { %s32_s19 = sshll.u32 %s92_s18, 4  ;;  %23 = vst [vmem:[#allocation5] sm:$0xff] %v21_v0  ;;  %25 = vst.msk [vmem:[#allocation5 + $0x8] sm:$0xff] %vm24_vm0, %v22_v1  ;;  %s33_s19 = int_to_ptr.vmem [resolvable:$true] %s32_s19 }
  0x14   :  { %s65_s20 = scalar_lea.vmem %s33_s19, 256  ;;  %p70_p9 = scmp.lt.s32.totalorder %s33_s19, %s33_s19 }
  0x15   :  { %p66_p8 = scmp.ne.s32.totalorder %s33_s19, %s65_s20  ;;  %p71_p10 = scmp.lt.s32.totalorder %s65_s20, %s65_s20 }
  0x17   :  { %p72_p11 = por %p71_p10, %p70_p9 }
  0x19   :  { %p73_p12 = pnand %p72_p11, %p66_p8 }
  0x1b   :  { %76 = shalt.err (!%p73_p12)
}
  0x1c   :  { %s77_s0 = scalar_lea.hbm %s128_s1, 256 }
  0x1d   :  { %p78_p13 = scmp.ne.s32.totalorder %s128_s1, %s77_s0  ;;  %p81_p0 = scmp.lt.u32.totalorder %s77_s0, %s128_s1 }
  0x1f   :  { %p83_p1 = pnand %p81_p0, %p78_p13 }
  0x21   :  { %86 = shalt.err (!%p83_p1)
}
  0x22   :  { %35 = dma.vmem_to_hbm [thread:$0]  %s33_s19, 256, %s128_s1, [#allocation4]  }
  0x23   :  { %89 = dma.done.wait [#allocation4], 256  }
  0x24   :  { %90 = vsyncadd [#allocation4], 4294967040 }
  0x25   :  { %39 = vsyncpa [#allocation3], 1 }
  0x26   :  { %40 = vsyncpa [#allocation4], 1 }

</bundles_post_ra>
